<compile_context>
chip_gen: v5e
topology: v5e:2x2
jax: 0.10.0
libtpu: 0.0.40
codegen_flags: <defaults>
</compile_context>

<pallas_src>
import math
import functools

import jax
import jax.numpy as jnp
from jax import lax
from jax.experimental import pallas as pl
from jax.experimental.pallas import tpu as pltpu


# ---------------------------------------------------------------------------
# helpers
# ---------------------------------------------------------------------------
def _pick_tile(dim, desired, multiple):
    """Largest tile <= desired that divides `dim` and is a multiple of `multiple`.

    Falls back to the full dim (always legal w.r.t. the (8,128) block constraint)."""
    if dim <= desired or dim % multiple != 0:
        return dim
    t = (min(desired, dim) // multiple) * multiple
    while t > multiple and dim % t != 0:
        t -= multiple
    return t if (t >= multiple and dim % t == 0) else dim


# ---------------------------------------------------------------------------
# Kernel 1: tiled dense layer  y = x @ W^T + b   (W^T pre-transposed by caller)
# ---------------------------------------------------------------------------
def _linear_kernel(x_ref, wt_ref, b_ref, o_ref, acc_ref):
    @pl.when(pl.program_id(2) == 0)
    def _():
        acc_ref[...] = jnp.zeros_like(acc_ref)

    acc_ref[...] += jnp.dot(x_ref[...], wt_ref[...],
                            preferred_element_type=jnp.float32)

    @pl.when(pl.program_id(2) == pl.num_programs(2) - 1)
    def _():
        # single fused epilogue: bias add + dtype cast + lane-dense store
        o_ref[...] = (acc_ref[...] + b_ref[...].astype(jnp.float32)).astype(o_ref.dtype)


def pallas_linear(x2d, w_t, bias, *, out_dtype=None,
                  tm_desired=512, tn_desired=256, tk_desired=512):
    """x2d: (N, d_in), w_t: (d_in, d_out) pre-transposed, bias: (d_out,)."""
    n, d_in = x2d.shape
    d_in2, d_out = w_t.shape
    assert d_in == d_in2
    out_dtype = out_dtype or x2d.dtype

    # 16-row M alignment matches bf16's native (16,128) sublane packing
    tm = _pick_tile(n, tm_desired, 16)
    tn = _pick_tile(d_out, tn_desired, 128)
    tk = _pick_tile(d_in, tk_desired, 128)
    grid = (n // tm, d_out // tn, d_in // tk)

    return pl.pallas_call(
        _linear_kernel,
        out_shape=jax.ShapeDtypeStruct((n, d_out), out_dtype),
        grid=grid,
        in_specs=[
            pl.BlockSpec((tm, tk), lambda i, j, k: (i, k)),
            pl.BlockSpec((tk, tn), lambda i, j, k: (k, j)),
            pl.BlockSpec((1, tn), lambda i, j, k: (0, j)),
        ],
        out_specs=pl.BlockSpec((tm, tn), lambda i, j, k: (i, j)),
        scratch_shapes=[pltpu.VMEM((tm, tn), jnp.float32)],
        compiler_params=pltpu.CompilerParams(
            dimension_semantics=("parallel", "parallel", "arbitrary"),
            vmem_limit_bytes=32 * 1024 * 1024),
    )(x2d, w_t, bias.reshape(1, d_out))


# ---------------------------------------------------------------------------
# Kernel 2: flash-style multi-head attention
#   grid = (B, Sq_blocks, Skv_blocks);   online softmax over the KV ("arbitrary") axis;
#   in-kernel head split (lane slices of the packed projections);
#   fused head-merge + single output-projection matmul in the KV-last epilogue;
#   bf16 lane-dense (TQ, d_model) output store.
# ---------------------------------------------------------------------------
def _mha_kernel(q_ref, k_ref, v_ref, bias_ref, wot_ref, bo_ref, o_ref,
                m_sc, l_sc, acc_sc, *, n_heads, causal, q_tile, kv_tile):
    # q_ref:    (1, TQ, d_model)  bf16   (1/sqrt(d_k) folded into Wq at prep time)
    # k_ref/v_ref: (1, TK, d_model) bf16
    # bias_ref: (1, 1, TK) f32 additive padding-mask bias (0 / -1e9)
    # wot_ref:  (d_model, d_model) bf16 = Wo^T;  bo_ref: (1, d_model) f32
    # o_ref:    (1, TQ, d_model) bf16
    # scratch:  m_sc/l_sc (TQ, h) f32; acc_sc (TQ, d_model) f32 (head-major lane layout)
    qi = pl.program_id(1)
    ki = pl.program_id(2)
    d_model = q_ref.shape[-1]
    d_k = d_model // n_heads

    @pl.when(ki == 0)
    def _():
        m_sc[...] = jnp.full(m_sc.shape, -jnp.inf, dtype=m_sc.dtype)
        l_sc[...] = jnp.zeros_like(l_sc)
        acc_sc[...] = jnp.zeros_like(acc_sc)

    q_start = qi * q_tile
    k_start = ki * kv_tile

    def compute():
        q_all = q_ref[0]                       # (TQ, d_model)
        k_all = k_ref[0]                       # (TK, d_model)
        v_all = v_ref[0]
        bias = bias_ref[0]                     # (1, TK), 0 / -1e9

        if causal:
            rows = q_start + lax.broadcasted_iota(jnp.int32, (q_tile, kv_tile), 0)
            cols = k_start + lax.broadcasted_iota(jnp.int32, (q_tile, kv_tile), 1)
            causal_bias = jnp.where(cols > rows, -1e9, 0.0).astype(jnp.float32)

        # static unroll over heads: QK^T / PV contraction width is d_k by construction;
        # the head-merged output projection below is the single full-width MXU matmul.
        for hh in range(n_heads):
            lo, hi = hh * d_k, (hh + 1) * d_k
            q_h = q_all[:, lo:hi]              # (TQ, d_k)
            k_h = k_all[:, lo:hi]              # (TK, d_k)
            v_h = v_all[:, lo:hi]

            s = jnp.einsum("qd,kd->qk", q_h, k_h,
                           preferred_element_type=jnp.float32)       # (TQ, TK)
            s = s + bias
            if causal:
                s = s + causal_bias

            m_prev = m_sc[:, hh:hh + 1]                               # (TQ, 1)
            m_new = jnp.maximum(m_prev, jnp.max(s, axis=-1, keepdims=True))
            alpha = jnp.exp(m_prev - m_new)                           # (TQ, 1)
            p = jnp.exp(s - m_new)                                    # (TQ, TK)

            l_sc[:, hh:hh + 1] = alpha * l_sc[:, hh:hh + 1] + \
                jnp.sum(p, axis=-1, keepdims=True)
            acc_sc[:, lo:hi] = alpha * acc_sc[:, lo:hi] + jnp.dot(
                p.astype(v_h.dtype), v_h, preferred_element_type=jnp.float32)
            m_sc[:, hh:hh + 1] = m_new

    if causal:
        # skip KV blocks entirely above the diagonal (ki == 0 is never skipped,
        # so the m/l/acc state is always initialized before the finalize step)
        pl.when(k_start <= q_start + (q_tile - 1))(compute)
    else:
        compute()

    @pl.when(ki == pl.num_programs(2) - 1)
    def _():
        inv_l = pl.reciprocal(l_sc[...])        # exact reciprocal, (TQ, h)
        ctx_parts = []
        for hh in range(n_heads):
            lo, hi = hh * d_k, (hh + 1) * d_k
            ctx_parts.append(acc_sc[:, lo:hi] * inv_l[:, hh:hh + 1])
        ctx = jnp.concatenate(ctx_parts, axis=1).astype(wot_ref.dtype)  # (TQ, d_model)
        # fused head-merge + single K=d_model output projection (full MXU width)
        out = jnp.dot(ctx, wot_ref[...],
                      preferred_element_type=jnp.float32) + bo_ref[...].astype(jnp.float32)
        o_ref[0] = out.astype(o_ref.dtype)


def pallas_mha_core(q_arr, k_arr, v_arr, q_col, k_col, v_col, mask_bias, wot, bo, *,
                    n_heads, causal=False, out_dtype=jnp.bfloat16,
                    tq_desired=128, tk_desired=256):
    """q_arr: (B, Sq, cq*d_model); k_arr/v_arr: (B, Skv, ck*d_model) (may alias q_arr for the
    packed QKV / KV layouts); q_col/k_col/v_col pick the d_model-wide column block of each;
    mask_bias: (B, 1, Skv) f32 additive bias; wot: (d_model, d_model) = Wo^T; bo: (d_model,)."""
    B, Sq, _ = q_arr.shape
    Skv = k_arr.shape[1]
    d_model = wot.shape[0]

    tq = _pick_tile(Sq, tq_desired, 8)
    tk = _pick_tile(Skv, tk_desired, 128)   # 128-mult keeps the (1,1,TK) bias block legal
    grid = (B, Sq // tq, Skv // tk)

    kernel = functools.partial(_mha_kernel, n_heads=n_heads, causal=causal,
                               q_tile=tq, kv_tile=tk)

    return pl.pallas_call(
        kernel,
        out_shape=jax.ShapeDtypeStruct((B, Sq, d_model), out_dtype),
        grid=grid,
        in_specs=[
            pl.BlockSpec((1, tq, d_model), lambda b, qi, ki: (b, qi, q_col)),
            pl.BlockSpec((1, tk, d_model), lambda b, qi, ki: (b, ki, k_col)),
            pl.BlockSpec((1, tk, d_model), lambda b, qi, ki: (b, ki, v_col)),
            pl.BlockSpec((1, 1, tk), lambda b, qi, ki: (b, 0, ki)),
            pl.BlockSpec((d_model, d_model), lambda b, qi, ki: (0, 0)),
            pl.BlockSpec((1, d_model), lambda b, qi, ki: (0, 0)),
        ],
        out_specs=pl.BlockSpec((1, tq, d_model), lambda b, qi, ki: (b, qi, 0)),
        scratch_shapes=[
            pltpu.VMEM((tq, n_heads), jnp.float32),   # running max  m
            pltpu.VMEM((tq, n_heads), jnp.float32),   # running sum  l
            pltpu.VMEM((tq, d_model), jnp.float32),   # merged (head-major) context acc
        ],
        compiler_params=pltpu.CompilerParams(
            dimension_semantics=("parallel", "parallel", "arbitrary"),
            vmem_limit_bytes=32 * 1024 * 1024),
    )(q_arr, k_arr, v_arr, mask_bias, wot, bo.reshape(1, d_model))


# ---------------------------------------------------------------------------
# parameter preparation (done ONCE): transpose / concat / cast / fold softmax scale
# ---------------------------------------------------------------------------
def prepare_mha_params(params, *, h, compute_dtype=jnp.bfloat16):
    """params = ((wq,bq),(wk,bk),(wv,bv),(wo,bo)), PyTorch layout w: (d_out, d_in)."""
    (wq, bq), (wk, bk), (wv, bv), (wo, bo) = params
    d_model = wq.shape[0]
    d_k = d_model // h
    scale = 1.0 / math.sqrt(d_k)
    wq_s, bq_s = wq * scale, bq * scale          # fold 1/sqrt(d_k) into the Q projection

    cdt = compute_dtype
    return dict(
        d_model=d_model, h=h, d_k=d_k, compute_dtype=cdt,
        # fused QKV (self-attention) / fused KV (cross-attention) / separate fallbacks
        wt_qkv=jnp.concatenate([wq_s, wk, wv], axis=0).T.astype(cdt),
        b_qkv=jnp.concatenate([bq_s, bk, bv], axis=0).astype(jnp.float32),
        wt_kv=jnp.concatenate([wk, wv], axis=0).T.astype(cdt),
        b_kv=jnp.concatenate([bk, bv], axis=0).astype(jnp.float32),
        wt_q=wq_s.T.astype(cdt), b_q=bq_s.astype(jnp.float32),
        wt_k=wk.T.astype(cdt), b_k=bk.astype(jnp.float32),
        wt_v=wv.T.astype(cdt), b_v=bv.astype(jnp.float32),
        # output projection: Wo^T, (d_model, d_model) — consumed by ONE merged-head matmul
        wot=wo.T.astype(cdt),
        bo=bo.astype(jnp.float32),
    )


def multi_headed_attention(prep, query, key, value, mask=None, *, causal=False):
    """query: (B,Sq,d_model); key/value: (B,Skv,d_model); mask: None | (B,Skv) | (B,1,Skv)
    padding mask; causal=True generates the subsequent-position mask in-kernel.
    Note: the fused QKV / fused KV fast paths dispatch on Python object identity
    (`query is key`); equal-but-distinct arrays fall back to three separate projections."""
    h, d_model = prep["h"], prep["d_model"]
    cdt = prep["compute_dtype"]
    B, Sq, _ = query.shape
    Skv = key.shape[1]

    def to2d(x):
        return x.reshape(-1, d_model).astype(cdt)

    if (query is key) and (key is value):
        # self-attention: single fused QKV matmul; packed result feeds the kernel directly
        qkv = pallas_linear(to2d(query), prep["wt_qkv"], prep["b_qkv"], out_dtype=cdt)
        packed = qkv.reshape(B, Sq, 3 * d_model)
        q_arr, k_arr, v_arr = packed, packed, packed
        q_col, k_col, v_col = 0, 1, 2
    elif key is value:
        # cross-attention: fused KV matmul + separate Q; no head-split transpose in XLA
        q_arr = pallas_linear(to2d(query), prep["wt_q"], prep["b_q"],
                              out_dtype=cdt).reshape(B, Sq, d_model)
        kv = pallas_linear(to2d(key), prep["wt_kv"], prep["b_kv"], out_dtype=cdt)
        packed = kv.reshape(B, Skv, 2 * d_model)
        k_arr, v_arr = packed, packed
        q_col, k_col, v_col = 0, 0, 1
    else:
        q_arr = pallas_linear(to2d(query), prep["wt_q"], prep["b_q"],
                              out_dtype=cdt).reshape(B, Sq, d_model)
        k_arr = pallas_linear(to2d(key), prep["wt_k"], prep["b_k"],
                              out_dtype=cdt).reshape(B, Skv, d_model)
        v_arr = pallas_linear(to2d(value), prep["wt_v"], prep["b_v"],
                              out_dtype=cdt).reshape(B, Skv, d_model)
        q_col, k_col, v_col = 0, 0, 0

    # padding mask -> additive bias (0 keep / -1e9 drop); causal structure is built in-kernel
    if mask is None:
        bias = jnp.zeros((B, 1, Skv), jnp.float32)
    else:
        m = mask.astype(jnp.float32)
        if m.ndim == 2:
            m = m[:, None, :]
        assert m.shape == (B, 1, Skv), \
            "pass padding masks as (B,1,Skv); use causal=True for subsequent-position masks"
        bias = (m - 1.0) * 1e9

    return pallas_mha_core(q_arr, k_arr, v_arr, q_col, k_col, v_col, bias,
                           prep["wot"], prep["bo"], n_heads=h, causal=causal,
                           out_dtype=cdt)


# ---------------------------------------------------------------------------
# Pure-JAX reference (PyTorch math, mirroring the kernel's bf16-matmul precision)
# ---------------------------------------------------------------------------
def reference_mha(params, query, key, value, mask, *, h, compute_dtype=jnp.bfloat16):
    (wq, bq), (wk, bk), (wv, bv), (wo, bo) = params
    B, Sq, d_model = query.shape
    Skv = key.shape[1]
    d_k = d_model // h
    cdt = compute_dtype

    def lin(x, w, b):
        y = jnp.dot(x.astype(cdt), w.T.astype(cdt),
                    preferred_element_type=jnp.float32) + b
        return y.astype(cdt)

    def split(y, S):
        return y.reshape(B, S, h, d_k).transpose(0, 2, 1, 3)

    q = split(lin(query.reshape(-1, d_model), wq, bq), Sq)
    k = split(lin(key.reshape(-1, d_model), wk, bk), Skv)
    v = split(lin(value.reshape(-1, d_model), wv, bv), Skv)

    scores = jnp.einsum("bhqd,bhkd->bhqk", q, k,
                        preferred_element_type=jnp.float32) / math.sqrt(d_k)
    m = jnp.ones((B, 1, Skv), jnp.float32) if mask is None else mask.astype(jnp.float32)
    if m.ndim == 2:
        m = m[:, None, :]
    scores = jnp.where(m[:, None, :, :] == 0, -1e9, scores)     # masked_fill, PyTorch-style
    p = jax.nn.softmax(scores, axis=-1)
    x = jnp.einsum("bhqk,bhkd->bhqd", p.astype(cdt), v,
                   preferred_element_type=jnp.float32)
    x = x.transpose(0, 2, 1, 3).reshape(B, Sq, d_model)
    return jnp.dot(x.astype(cdt), wo.T.astype(cdt),
                   preferred_element_type=jnp.float32) + bo


# ---------------------------------------------------------------------------
if __name__ == "__main__":
    B, S_src, S_tgt, d_model, h = 2, 16, 16, 256, 8

    key0 = jax.random.PRNGKey(0)
    keys = jax.random.split(key0, 12)

    # PyTorch nn.Linear default init: U(-1/sqrt(fan_in), 1/sqrt(fan_in))
    bound = 1.0 / math.sqrt(d_model)

    def make_linear(kw, kb):
        w = jax.random.uniform(kw, (d_model, d_model), jnp.float32, -bound, bound)
        b = jax.random.uniform(kb, (d_model,), jnp.float32, -bound, bound)
        return w, b

    params = tuple(make_linear(keys[2 * i], keys[2 * i + 1]) for i in range(4))
    prep = prepare_mha_params(params, h=h)

    # stand-ins for src_embed(src) (Video-Swin features) and tgt_embed(tgt)
    x_src = jax.random.normal(keys[8], (B, S_src, d_model), jnp.float32)
    x_tgt = jax.random.normal(keys[9], (B, S_tgt, d_model), jnp.float32)

    # src padding mask (B, 1, S_src): batch 1 has its last 6 memory positions masked
    src_mask = jnp.ones((B, 1, S_src), jnp.float32).at[1, 0, -6:].set(0.0)
    # reference-only explicit tgt subsequent (causal) mask (the kernel builds it in-kernel)
    tgt_mask_ref = jnp.broadcast_to(jnp.tril(jnp.ones((S_tgt, S_tgt), jnp.float32)),
                                    (B, S_tgt, S_tgt))

    tol = dict(atol=2e-2, rtol=2e-2)

    # 1) encoder self-attention (fused-QKV path, padding mask)
    memory = multi_headed_attention(prep, x_src, x_src, x_src, src_mask)
    memory = jax.block_until_ready(memory)
    ref1 = reference_mha(params, x_src, x_src, x_src, src_mask, h=h)
    assert memory.shape == (B, S_src, d_model)
    assert jnp.allclose(memory, ref1, **tol), "self-attention mismatch"

    # 2) decoder masked self-attention (causal mask generated in-kernel)
    dec_self = multi_headed_attention(prep, x_tgt, x_tgt, x_tgt, mask=None, causal=True)
    dec_self = jax.block_until_ready(dec_self)
    ref2 = reference_mha(params, x_tgt, x_tgt, x_tgt, tgt_mask_ref, h=h)
    assert jnp.allclose(dec_self, ref2, **tol), "masked self-attention mismatch"

    # 3) decoder cross-attention (fused-KV path, src padding mask)
    cross = multi_headed_attention(prep, dec_self, memory, memory, src_mask)
    cross = jax.block_until_ready(cross)
    ref3 = reference_mha(params, dec_self, memory, memory, src_mask, h=h)
    assert cross.shape == (B, S_tgt, d_model)
    assert jnp.allclose(cross, ref3, **tol), "cross-attention mismatch"

    # 4) fully-masked rows stay finite (additive -1e9 bias, no -inf NaNs)
    out_full = multi_headed_attention(prep, x_src, x_src, x_src,
                                      jnp.zeros((B, 1, S_src), jnp.float32))
    out_full = jax.block_until_ready(out_full)
    assert bool(jnp.isfinite(out_full.astype(jnp.float32)).all()), "NaN/inf on fully-masked rows"

    print("KERNEL_OK")
</pallas_src>

<mosaic_0001>
module attributes {stable_mosaic.version = 11 : i64} {
  func.func @_linear_kernel(%arg0: i32, %arg1: i32, %arg2: i32, %arg3: memref<32x256xbf16, #tpu.memory_space<vmem>>, %arg4: memref<256x256xbf16, #tpu.memory_space<vmem>>, %arg5: memref<1x256xf32, #tpu.memory_space<vmem>>, %arg6: memref<32x256xbf16, #tpu.memory_space<vmem>>, %arg7: memref<32x256xf32, #tpu.memory_space<vmem>>) attributes {dimension_semantics = [#tpu.dimension_semantics<parallel>, #tpu.dimension_semantics<parallel>, #tpu.dimension_semantics<arbitrary>], iteration_bounds = array<i64: 1, 3, 1>, scalar_prefetch = 0 : i64, scratch_operands = 1 : i64, tpu.core_type = #tpu.core_type<tc>, window_params = [{transform_indices = @transform_0, window_bounds = array<i64: 32, 256>}, {transform_indices = @transform_1, window_bounds = array<i64: 256, 256>}, {transform_indices = @transform_2, window_bounds = array<i64: 1, 256>}, {transform_indices = @transform_3, window_bounds = array<i64: 32, 256>}]} {
    %c0_i32 = arith.constant 0 : i32
    %0 = arith.cmpi eq, %arg2, %c0_i32 : i32
    %1 = arith.extui %0 : i1 to i32
    %c0_i32_0 = arith.constant 0 : i32
    %2 = arith.cmpi ne, %1, %c0_i32_0 : i32
    scf.if %2 {
      %cst_10 = arith.constant 0.000000e+00 : f32
      %12 = vector.broadcast %cst_10 : f32 to vector<32x256xf32>
      %c0_11 = arith.constant 0 : index
      %c0_12 = arith.constant 0 : index
      %13 = vector.load %arg7[%c0_11, %c0_12] : memref<32x256xf32, #tpu.memory_space<vmem>>, vector<32x256xf32>
      tpu.vector_store %arg7[%c0_11, %c0_12], %12 {strides = array<i32>} : memref<32x256xf32, #tpu.memory_space<vmem>>, vector<32x256xf32>,
    } else {
    }
    %c0 = arith.constant 0 : index
    %c0_1 = arith.constant 0 : index
    %3 = vector.load %arg7[%c0, %c0_1] : memref<32x256xf32, #tpu.memory_space<vmem>>, vector<32x256xf32>
    %c0_2 = arith.constant 0 : index
    %c0_3 = arith.constant 0 : index
    %4 = vector.load %arg3[%c0_2, %c0_3] : memref<32x256xbf16, #tpu.memory_space<vmem>>, vector<32x256xbf16>
    %c0_4 = arith.constant 0 : index
    %c0_5 = arith.constant 0 : index
    %5 = vector.load %arg4[%c0_4, %c0_5] : memref<256x256xbf16, #tpu.memory_space<vmem>>, vector<256x256xbf16>
    %cst = arith.constant dense<0.000000e+00> : vector<32x256xf32>
    %6 = tpu.matmul %4, %5, %cst {dimension_numbers = #tpu.dot_dimension_numbers<[1], [0], [0], [1], [0, 0, 1, 1], [], []>} : vector<32x256xbf16>, vector<256x256xbf16>, vector<32x256xf32> -> vector<32x256xf32>
    %7 = arith.addf %3, %6 : vector<32x256xf32>
    %c0_6 = arith.constant 0 : index
    %c0_7 = arith.constant 0 : index
    %8 = vector.load %arg7[%c0_6, %c0_7] : memref<32x256xf32, #tpu.memory_space<vmem>>, vector<32x256xf32>
    tpu.vector_store %arg7[%c0_6, %c0_7], %7 {strides = array<i32>} : memref<32x256xf32, #tpu.memory_space<vmem>>, vector<32x256xf32>,
    %c0_i32_8 = arith.constant 0 : i32
    %9 = arith.cmpi eq, %arg2, %c0_i32_8 : i32
    %10 = arith.extui %9 : i1 to i32
    %c0_i32_9 = arith.constant 0 : i32
    %11 = arith.cmpi ne, %10, %c0_i32_9 : i32
    scf.if %11 {
      %c0_10 = arith.constant 0 : index
      %c0_11 = arith.constant 0 : index
      %12 = vector.load %arg7[%c0_10, %c0_11] : memref<32x256xf32, #tpu.memory_space<vmem>>, vector<32x256xf32>
      %c0_12 = arith.constant 0 : index
      %c0_13 = arith.constant 0 : index
      %13 = vector.load %arg5[%c0_12, %c0_13] : memref<1x256xf32, #tpu.memory_space<vmem>>, vector<1x256xf32>
      %14 = vector.broadcast %13 : vector<1x256xf32> to vector<32x256xf32>
      %15 = arith.addf %12, %14 : vector<32x256xf32>
      %16 = arith.truncf %15 : vector<32x256xf32> to vector<32x256xbf16>
      %c0_14 = arith.constant 0 : index
      %c0_15 = arith.constant 0 : index
      %17 = vector.load %arg6[%c0_14, %c0_15] : memref<32x256xbf16, #tpu.memory_space<vmem>>, vector<32x256xbf16>
      tpu.vector_store %arg6[%c0_14, %c0_15], %16 {strides = array<i32>} : memref<32x256xbf16, #tpu.memory_space<vmem>>, vector<32x256xbf16>,
    } else {
    }
    return
  }
  func.func @transform_0(%arg0: i32, %arg1: i32, %arg2: i32) -> (i32, i32) {
    %c0_i32 = arith.constant 0 : i32
    return %arg0, %arg2 : i32, i32
  }
  func.func @transform_1(%arg0: i32, %arg1: i32, %arg2: i32) -> (i32, i32) {
    %c0_i32 = arith.constant 0 : i32
    return %arg2, %arg1 : i32, i32
  }
  func.func @transform_2(%arg0: i32, %arg1: i32, %arg2: i32) -> (i32, i32) {
    %c0_i32 = arith.constant 0 : i32
    %c0_i32_0 = arith.constant 0 : i32
    return %c0_i32, %arg1 : i32, i32
  }
  func.func @transform_3(%arg0: i32, %arg1: i32, %arg2: i32) -> (i32, i32) {
    %c0_i32 = arith.constant 0 : i32
    return %arg0, %arg1 : i32, i32
  }
}

</mosaic_0001>

<bundles_post_ra>
// kernel: tpu_custom_call.1
= control target key start
LH: loop header
LB: loop body
LE: loop exit
PB: predicated region body
PF: predicated region fallthrough
CT: control target
= control target key end

     0   :  { %s1536_s0 = inlined_call_operand.hbm [shape: bf16[32,256], index: 0, kind: input, shape index: {}]   ;;  %s1537_s1 = inlined_call_operand.hbm [shape: bf16[256,768], index: 1, kind: input, shape index: {}]   ;;  %s1538_s2 = inlined_call_operand.hbm [shape: f32[1,768], index: 2, kind: input, shape index: {}]   ;;  %s1539_s3 = inlined_call_operand.hbm [shape: bf16[32,768], index: 3, kind: output, shape index: {}]  }
   0x1   :  { %1542 = sst [smem:[#allocation13_spill]] %s1536_s0 }
   0x2   :  { %1543 = sst [smem:[#allocation14_spill]] %s1537_s1 }
   0x3   :  { %8 = vsyncpa [#allocation4], 0 }
   0x4   :  { %9 = vsyncpa [#allocation7], 0 }
   0x5   :  { %11 = vsyncpa [#allocation7 + $0x1], 0 }
   0x6   :  { %12 = vsyncpa [#allocation5], 0 }
   0x7   :  { %14 = vsyncpa [#allocation5 + $0x1], 0  ;;  %s1288_s12 = smov 0   ;;  %s1290_s13 = smov 0  }
   0x8   :  { %s1292_s14 = smov 0   ;;  %s1294_s15 = smov 0  }
   0x9   :  { %s1296_s16 = smov 0   ;;  %s1298_s17 = smov 0  }
   0xa LB: > { %s35_s18 = sadd.s32 1, %s1255_s16  ;;  %s76_s19 = sadd.s32 1, %s1247_s14  ;;  %s1259_s17 = sphi %s1298_s17, %s20_s17   ;;  %s1255_s16 = sphi %s1296_s16, %s1558_s16   ;;  %s1251_s15 = sphi %s1294_s15, %s1557_s15   ;;  %s1247_s14 = sphi %s1292_s14, %s1556_s14   ;;  %s1243_s13 = sphi %s1290_s13, %s1555_s13   ;;  %s1239_s12 = sphi %s1288_s12, %s1554_s12  }
   0xb   : > { %p37_p0 = scmp.ge.s32.totalorder %s35_s18, 3  ;;  %p83_p1 = scmp.ne.s32.totalorder %s1247_s14, %s1243_s13 }
   0xc   : > { %p84_p2 = scmp.eq.s32.totalorder %s1259_s17, 0  ;;  %p1025_p5 = scmp.lt.s32.totalorder %s1259_s17, 3 }
   0xd   : > { %s1560_s18 = smov (%p37_p0, %s35_s18), 0  ;;  %s187_s22 = sand.u32 1, %s1259_s17  }
   0xe   : > { %p1328_p3 = por %p84_p2, %p83_p1  ;;  %s72_s21 = ssub.s32 %s1255_s16, %s1560_s18 }
   0xf   : > { %p74_p4 = scmp.eq.s32.totalorder %s72_s21, 0  ;;  %s189_s23 = sand.u32 1, %s1247_s14  }
  0x10   : > { %s802_s25 = sshll.u32 %s189_s23, 8  ;;  %s961_s26 = sshll.u32 %s1255_s16, 3 }
  0x11   : > { %s1338_s24 = scalar_select %p74_p4, %s1247_s14, %s76_s19  }
  0x12   : > { %s1545_s1 = sld [smem:[#allocation14_spill]]  ;;  %s191_s30 = scalar_lea.vmem [#allocation6], %s802_s25 }
  0x13   : > { %s202_s4 = sshll.u32 %s191_s30, 4  ;;  %p1348_p6 = pnand %p1025_p5, %p1328_p3  ;;  %s203_s4 = int_to_ptr.vmem [resolvable:$true] %s202_s4 }
  0x14   : > { %s1352_s7 = scalar_lea.sflag [#allocation7], %s187_s22  ;;  %s1261_s8 = smov 384  }
  0x15   : > { %s1540_s9 = smov 128   ;;  %s1541_s10 = smov 8  }
  0x16   : > { %s1360_s11 = sadd.s32 4294967295, %s1259_s17   ;;  %s798_s19 = sadd.s32 4294967294, %s1259_s17  }
  0x17   : > { %p89_p7 = scmp.ne.s32.totalorder %s1243_s13, %s1239_s12  ;;  %p90_p8 = scmp.eq.s32.totalorder %s1360_s11, 0 }
  0x18   : > { %s199_s29 = scalar_lea.hbm %s1545_s1, %s961_s26  ;;  %p141_p9 = scmp.eq.s32.totalorder %s1360_s11, 2 }
  0x19   : > { %s200_s5 = sshll.u32 %s199_s29, 4  ;;  %p147_p10 = scmp.eq.s32.totalorder %s798_s19, 2  ;;  %s201_s5 = int_to_ptr.hbm [resolvable:$true] %s200_s5 }
  0x1a   : > { %1016 = dma.hbm_to_vmem [thread:$0]  (!%p1348_p6), %s201_s5, 4096, %s203_s4, %s1352_s7, %s1261_s8, %s1540_s9, %s1541_s10  }
  0x1b   : > { %p1369_p11 = por %p90_p8, %p89_p7  ;;  %p799_p12 = scmp.ge.s32.totalorder %s1259_s17, 1 }
  0x1c   : > { %p1377_p13 = por %p141_p9, %p83_p1  ;;  %p1381_p0 = por %p147_p10, %p89_p7 }
  0x1d   : > { %p154_p2 = scmp.lt.s32.totalorder %s1259_s17, 4  ;;  %s1550_s0 = sld [smem:[#allocation13_spill]] }
  0x1e   : > { %s1264_s29 = smov [#allocation3]   ;;  %s805_s4 = sshll.u32 %s189_s23, 1 }
  0x1f   : > { %p1389_p3 = pnand %p799_p12, %p154_p2  ;;  %s173_s30 = sshll.u32 %s1264_s29, 4  ;;  %s174_s30 = int_to_ptr.vmem [resolvable:$true] %s173_s30 }
  0x20   : > { %s806_s5 = sshll.u32 %s1255_s16, 1  ;;  %s216_s9 = scalar_lea.vmem [#allocation8], %s805_s4 }
  0x21   : > { %p1009_p1 = pneg %p1389_p3  ;;  %s220_s25 = scalar_lea.hbm %s1538_s2, %s806_s5 }
  0x22   : > { %s222_s26 = sshll.u32 %s220_s25, 4  ;;  %s224_s10 = sshll.u32 %s216_s9, 4  ;;  %s223_s26 = int_to_ptr.hbm [resolvable:$true] %s222_s26  ;;  %s225_s10 = int_to_ptr.vmem [resolvable:$true] %s224_s10 }
  0x23   : > { %s171_s27 = sshll.u32 %s1550_s0, 4  ;;  %p1010_p4 = pnand %p1009_p1, %p90_p8  ;;  %s172_s27 = int_to_ptr.hbm [resolvable:$true] %s171_s27 }
  0x24   : > { %s1552_s0 = smov 8   ;;  %s1553_s1 = smov 128  }
  0x25   : > { %1012 = dma.hbm_to_vmem [thread:$0]  (!%p1010_p4), %s172_s27, 512, %s174_s30, [#allocation4], %s1553_s1, %s1553_s1, %s1552_s0  }
  0x26   : > { %1019 = dma.hbm_to_vmem [thread:$0]  (!%p1348_p6), %s223_s26, 32, %s225_s10, %s1352_s7  }
  0x27   : > { %233 = sbr.rel (%p1389_p3) target bundleno = 253 (0xfd), region = 32 }
  0x2c   : > { %1226 = dma.done.wait (%p90_p8), [#allocation4], 512  }
  0x2d   : > { %1228 = vsyncadd (%p90_p8), [#allocation4], 4294966784  ;;  %s240_s23 = sand.u32 1, %s1360_s11   ;;  %s1417_s9 = sand.u32 1, %s1243_s13  }
  0x2e   : > { %s809_s0 = sshll.u32 %s1417_s9, 8  ;;  %s241_s1 = scalar_lea.sflag [#allocation7], %s240_s23 }
  0x2f   : > { %s1420_s6 = scalar_lea.vmem [#allocation6], %s809_s0 }
  0x30   : > { %1230 = dma.done.wait (%p1369_p11), %s241_s1, 4128  }
  0x31   : > { %1232 = vsyncadd (%p1369_p11), %s241_s1, 4294963168  ;;  %v886_v0 = vld [vmem:[%s1420_s6 + $0x70] sm:$0xf]  ;;  %v981_v1 = vld [vmem:[%s1420_s6 + $0x74] sm:$0xf0]  ;;  %s810_s7 = sshll.u32 %s1417_s9, 1 }
  0x32   : > { %v950_v2 = vld [vmem:[%s1420_s6 + $0xf0] sm:$0xf]  ;;  %v887_v3 = vor.u32 %v981_v1, %v886_v0  ;;  %v997_v4 = vld [vmem:[%s1420_s6 + $0xf4] sm:$0xf0]  ;;  %v980_v5 = vld [vmem:[%s1420_s6 + $0x74] sm:$0xf] }
  0x33   : > { %v888_v6 = vld [vmem:[%s1420_s6 + $0x78] sm:$0xf0]  ;;  %v951_v7 = vor.u32 %v997_v4, %v950_v2  ;;  %v996_v9 = vld [vmem:[%s1420_s6 + $0xf4] sm:$0xf]  ;;  %v878_v11 = vld [vmem:[%s1420_s6 + $0x60] sm:$0xf] }
  0x34   : > { %v891_v8 = vor.u32 %v980_v5, %v888_v6  ;;  %v952_v10 = vld [vmem:[%s1420_s6 + $0xf8] sm:$0xf0]  ;;  %526 = vmatpush.bf16.msra.mxu0 %v887_v3  ;;  %v979_v13 = vld [vmem:[%s1420_s6 + $0x64] sm:$0xf0]  ;;  %v942_v14 = vld [vmem:[%s1420_s6 + $0xe0] sm:$0xf] }
  0x35   : > { %v955_v12 = vor.u32 %v996_v9, %v952_v10  ;;  %v995_v15 = vld [vmem:[%s1420_s6 + $0xe4] sm:$0xf0]  ;;  %545 = vmatpush.bf16.msra.mxu1 %v951_v7  ;;  %v879_v16 = vor.u32 %v979_v13, %v878_v11  ;;  %v978_v18 = vld [vmem:[%s1420_s6 + $0x64] sm:$0xf]  ;;  %v880_v19 = vld [vmem:[%s1420_s6 + $0x68] sm:$0xf0] }
  0x36   : > { %564 = vmatpush.bf16.msra.mxu2 %v891_v8  ;;  %v943_v17 = vor.u32 %v995_v15, %v942_v14  ;;  %v994_v20 = vld [vmem:[%s1420_s6 + $0xe4] sm:$0xf]  ;;  %v883_v21 = vor.u32 %v978_v18, %v880_v19  ;;  %v944_v22 = vld [vmem:[%s1420_s6 + $0xe8] sm:$0xf0]  ;;  %v870_v23 = vld [vmem:[%s1420_s6 + $0x50] sm:$0xf] }
  0x37   : > { %583 = vmatpush.bf16.msra.mxu3 %v955_v12  ;;  %v977_v24 = vld [vmem:[%s1420_s6 + $0x54] sm:$0xf0]  ;;  %v947_v25 = vor.u32 %v994_v20, %v944_v22  ;;  %v934_v26 = vld [vmem:[%s1420_s6 + $0xd0] sm:$0xf]  ;;  %v976_v28 = vld [vmem:[%s1420_s6 + $0x54] sm:$0xf] }
  0x38   : > { %v993_v27 = vld [vmem:[%s1420_s6 + $0xd4] sm:$0xf0]  ;;  %527 = vmatpush.bf16.msra.mxu0 %v879_v16  ;;  %v871_v29 = vor.u32 %v977_v24, %v870_v23  ;;  %v872_v30 = vld [vmem:[%s1420_s6 + $0x58] sm:$0xf0]  ;;  %v992_v31 = vld [vmem:[%s1420_s6 + $0xd4] sm:$0xf] }
  0x39   : > { %v936_v32 = vld [vmem:[%s1420_s6 + $0xd8] sm:$0xf0]  ;;  %546 = vmatpush.bf16.msra.mxu1 %v943_v17  ;;  %v935_v33 = vor.u32 %v993_v27, %v934_v26  ;;  %v875_v34 = vor.u32 %v976_v28, %v872_v30  ;;  %v862_v35 = vld [vmem:[%s1420_s6 + $0x40] sm:$0xf]  ;;  %v975_v36 = vld [vmem:[%s1420_s6 + $0x44] sm:$0xf0] }
  0x3a   : > { %565 = vmatpush.bf16.msra.mxu2 %v883_v21  ;;  %v926_v37 = vld [vmem:[%s1420_s6 + $0xc0] sm:$0xf]  ;;  %v939_v38 = vor.u32 %v992_v31, %v936_v32  ;;  %v991_v39 = vld [vmem:[%s1420_s6 + $0xc4] sm:$0xf0]  ;;  %v974_v40 = vld [vmem:[%s1420_s6 + $0x44] sm:$0xf]  ;;  %v863_v44 = vor.u32 %v975_v36, %v862_v35 }
  0x3b   : > { %584 = vmatpush.bf16.msra.mxu3 %v947_v25  ;;  %v864_v41 = vld [vmem:[%s1420_s6 + $0x48] sm:$0xf0]  ;;  %v990_v42 = vld [vmem:[%s1420_s6 + $0xc4] sm:$0xf]  ;;  %v927_v45 = vor.u32 %v991_v39, %v926_v37  ;;  %v854_v47 = vld [vmem:[%s1420_s6 + $0x30] sm:$0xf] }
  0x3c   : > { %v928_v43 = vld [vmem:[%s1420_s6 + $0xc8] sm:$0xf0]  ;;  %528 = vmatpush.bf16.msra.mxu0 %v871_v29  ;;  %v867_v46 = vor.u32 %v974_v40, %v864_v41  ;;  %v973_v48 = vld [vmem:[%s1420_s6 + $0x34] sm:$0xf0]  ;;  %v918_v49 = vld [vmem:[%s1420_s6 + $0xb0] sm:$0xf] }
  0x3d   : > { %547 = vmatpush.bf16.msra.mxu1 %v935_v33  ;;  %v931_v50 = vor.u32 %v990_v42, %v928_v43  ;;  %v989_v51 = vld [vmem:[%s1420_s6 + $0xb4] sm:$0xf0]  ;;  %v972_v52 = vld [vmem:[%s1420_s6 + $0x34] sm:$0xf]  ;;  %v856_v53 = vld [vmem:[%s1420_s6 + $0x38] sm:$0xf0]  ;;  %v855_v56 = vor.u32 %v973_v48, %v854_v47 }
  0x3e   : > { %566 = vmatpush.bf16.msra.mxu2 %v875_v34  ;;  %v988_v54 = vld [vmem:[%s1420_s6 + $0xb4] sm:$0xf]  ;;  %v920_v55 = vld [vmem:[%s1420_s6 + $0xb8] sm:$0xf0]  ;;  %v919_v57 = vor.u32 %v989_v51, %v918_v49  ;;  %v859_v58 = vor.u32 %v972_v52, %v856_v53  ;;  %v846_v59 = vld [vmem:[%s1420_s6 + $0x20] sm:$0xf] }
  0x3f   : > { %585 = vmatpush.bf16.msra.mxu3 %v939_v38  ;;  %v971_v60 = vld [vmem:[%s1420_s6 + $0x24] sm:$0xf0]  ;;  %v910_v61 = vld [vmem:[%s1420_s6 + $0xa0] sm:$0xf]  ;;  %v923_v62 = vor.u32 %v988_v54, %v920_v55  ;;  %v970_v0 = vld [vmem:[%s1420_s6 + $0x24] sm:$0xf] }
  0x40   : > { %529 = vmatpush.bf16.msra.mxu0 %v863_v44  ;;  %v987_v63 = vld [vmem:[%s1420_s6 + $0xa4] sm:$0xf0]  ;;  %v848_v1 = vld [vmem:[%s1420_s6 + $0x28] sm:$0xf0]  ;;  %v986_v2 = vld [vmem:[%s1420_s6 + $0xa4] sm:$0xf]  ;;  %v847_v4 = vor.u32 %v971_v60, %v846_v59 }
  0x41   : > { %548 = vmatpush.bf16.msra.mxu1 %v927_v45  ;;  %v912_v3 = vld [vmem:[%s1420_s6 + $0xa8] sm:$0xf0]  ;;  %v911_v5 = vor.u32 %v987_v63, %v910_v61  ;;  %v851_v6 = vor.u32 %v970_v0, %v848_v1  ;;  %v838_v7 = vld [vmem:[%s1420_s6 + $0x10] sm:$0xf]  ;;  %v969_v8 = vld [vmem:[%s1420_s6 + $0x14] sm:$0xf0] }
  0x42   : > { %567 = vmatpush.bf16.msra.mxu2 %v867_v46  ;;  %v902_v9 = vld [vmem:[%s1420_s6 + $0x90] sm:$0xf]  ;;  %v915_v10 = vor.u32 %v986_v2, %v912_v3  ;;  %v985_v11 = vld [vmem:[%s1420_s6 + $0x94] sm:$0xf0]  ;;  %v968_v12 = vld [vmem:[%s1420_s6 + $0x14] sm:$0xf]  ;;  %v839_v16 = vor.u32 %v969_v8, %v838_v7 }
  0x43   : > { %586 = vmatpush.bf16.msra.mxu3 %v931_v50  ;;  %v840_v13 = vld [vmem:[%s1420_s6 + $0x18] sm:$0xf0]  ;;  %v984_v14 = vld [vmem:[%s1420_s6 + $0x94] sm:$0xf]  ;;  %v903_v17 = vor.u32 %v985_v11, %v902_v9  ;;  %v830_v19 = vld [vmem:[%s1420_s6] sm:$0xf] }
  0x44   : > { %530 = vmatpush.bf16.msra.mxu0 %v855_v56  ;;  %v904_v15 = vld [vmem:[%s1420_s6 + $0x98] sm:$0xf0]  ;;  %v843_v18 = vor.u32 %v968_v12, %v840_v13  ;;  %v967_v20 = vld [vmem:[%s1420_s6 + $0x4] sm:$0xf0]  ;;  %v894_v21 = vld [vmem:[%s1420_s6 + $0x80] sm:$0xf] }
  0x45   : > { %549 = vmatpush.bf16.msra.mxu1 %v919_v57  ;;  %v907_v22 = vor.u32 %v984_v14, %v904_v15  ;;  %v983_v23 = vld [vmem:[%s1420_s6 + $0x84] sm:$0xf0]  ;;  %v966_v24 = vld [vmem:[%s1420_s6 + $0x4] sm:$0xf]  ;;  %v832_v25 = vld [vmem:[%s1420_s6 + $0x8] sm:$0xf0]  ;;  %v831_v28 = vor.u32 %v967_v20, %v830_v19 }
  0x46   : > { %568 = vmatpush.bf16.msra.mxu2 %v859_v58  ;;  %v982_v26 = vld [vmem:[%s1420_s6 + $0x84] sm:$0xf]  ;;  %v896_v27 = vld [vmem:[%s1420_s6 + $0x88] sm:$0xf0]  ;;  %v814_v29 = vld [vmem:[#allocation3] sm:$0xf]  ;;  %v895_v31 = vor.u32 %v983_v23, %v894_v21  ;;  %v835_v32 = vor.u32 %v966_v24, %v832_v25 }
  0x47   : > { %587 = vmatpush.bf16.msra.mxu3 %v923_v62  ;;  %v963_v30 = vld [vmem:[#allocation3 + $0x4] sm:$0xf0]  ;;  %v962_v33 = vld [vmem:[#allocation3 + $0x4] sm:$0xf]  ;;  %v816_v34 = vld [vmem:[#allocation3 + $0x8] sm:$0xf0]  ;;  %v899_v35 = vor.u32 %v982_v26, %v896_v27 }
  0x48   : > { %531 = vmatpush.bf16.msra.mxu0 %v847_v4  ;;  %v815_v36 = vor.u32 %v963_v30, %v814_v29  ;;  %v819_v37 = vor.u32 %v962_v33, %v816_v34  ;;  %v822_v38 = vld [vmem:[#allocation3 + $0x10] sm:$0xf]  ;;  %v965_v39 = vld [vmem:[#allocation3 + $0x14] sm:$0xf0]  ;;  %v964_v40 = vld [vmem:[#allocation3 + $0x14] sm:$0xf] }
  0x49   : > { %550 = vmatpush.bf16.msra.mxu1 %v911_v5  ;;  %v824_v41 = vld [vmem:[#allocation3 + $0x18] sm:$0xf0]  ;;  %v823_v42 = vor.u32 %v965_v39, %v822_v38  ;;  %s254_s10 = scalar_lea.vmem [#allocation8], %s810_s7  ;;  %s811_s11 = sshll.u32 %s1417_s9, 5 }
  0x4a   : > { %569 = vmatpush.bf16.msra.mxu2 %v851_v6  ;;  %v827_v43 = vor.u32 %v964_v40, %v824_v41  ;;  %v629_v46 = vld [vmem:[%s254_s10] sm:$0x3]  ;;  %s1492_s20 = scalar_lea.vmem [#allocation9], %s811_s11  ;;  %s998_s27 = sshll.u32 %s1251_s15, 3 }
  0x4b   : > { %588 = vmatpush.bf16.msra.mxu3 %v915_v10  ;;  %v631_v48 = vperm.slane %v629_v46, 0  ;;  %v632_v50 = vperm.slane %v629_v46, 1  ;;  %s666_s30 = scalar_lea.hbm %s1539_s3, %s998_s27  ;;  %s667_s4 = sshll.u32 %s1492_s20, 4  ;;  %s668_s4 = int_to_ptr.vmem [resolvable:$true] %s667_s4 }
  0x4c   : > { %532 = vmatpush.bf16.msra.mxu0 %v839_v16  ;;  %s669_s5 = sshll.u32 %s666_s30, 4  ;;  %s652_s15 = scalar_lea.sflag [#allocation5], %s1417_s9  ;;  %s670_s5 = int_to_ptr.hbm [resolvable:$true] %s669_s5 }
  0x4d   : > { %551 = vmatpush.bf16.msra.mxu1 %v903_v17  ;;  %s1187_s8 = sshra.s32 %s670_s5, 4  ;;  %s1193_s23 = scalar_lea.hbm %s1539_s3, 96  ;;  %s1188_s8 = int_to_ptr.hbm [resolvable:$true] %s1187_s8 }
  0x4e   : > { %570 = vmatpush.bf16.msra.mxu2 %v843_v18  ;;  %s1189_s19 = scalar_lea.hbm %s1188_s8, 32  ;;  %p1194_p8 = scmp.lt.s32.totalorder %s1188_s8, %s1539_s3 }
  0x4f   : > { %589 = vmatpush.bf16.msra.mxu3 %v907_v22  ;;  %p1190_p5 = scmp.ne.s32.totalorder %s1188_s8, %s1189_s19  ;;  %p1195_p9 = scmp.lt.s32.totalorder %s1193_s23, %s1189_s19 }
  0x50   : > { %533 = vmatpush.bf16.msra.mxu0 %v831_v28 }
  0x51   : > { %552 = vmatpush.bf16.msra.mxu1 %v895_v31  ;;  %p1191_p6 = pnand %p1190_p5, %p1377_p13  ;;  %p1196_p10 = por %p1195_p9, %p1194_p8 }
  0x52   : > { %571 = vmatpush.bf16.msra.mxu2 %v835_v32 }
  0x53   : > { %590 = vmatpush.bf16.msra.mxu3 %v899_v35  ;;  %534 = vmatmul.bf16.vlgmr.msra.gmra.mxu0 %v815_v36  ;;  %p1192_p7 = pneg %p1191_p6 }
  0x54   : > { %553 = vmatmul.bf16.vlgmr.msra.gmra.mxu1 %v819_v37 }
  0x55   : > { %572 = vmatmul.bf16.vlgmr.msra.gmra.mxu2 %v815_v36  ;;  %p1197_p11 = pnand %p1196_p10, %p1192_p7 }
  0x56   : > { %591 = vmatmul.bf16.vlgmr.msra.gmra.mxu3 %v819_v37 }
  0x63   : > { %539 = vmatmul.bf16.gmra.mxu0 %v823_v42 }
  0x64   : > { %558 = vmatmul.bf16.gmra.mxu1 %v827_v43 }
  0x65   : > { %577 = vmatmul.bf16.gmra.mxu2 %v823_v42 }
  0x66   : > { %596 = vmatmul.bf16.gmra.mxu3 %v827_v43 }
  0xd0   : > { %v535_v44 = vpop.f32.mrf.mxu0 }
  0xd1   : > { %v554_v45 = vpop.f32.mrf.mxu1 }
  0xd2   : > { %v555_v47 = vadd.f32 %v554_v45, %v535_v44 }
  0xd4   : > { %v635_v53 = vadd.f32 %v631_v48, %v555_v47 }
  0xd8   : > { %v573_v49 = vpop.f32.mrf.mxu2  ;;  %v537_v52 = vpop.f32.mrf.mxu0 }
  0xd9   : > { %v592_v51 = vpop.f32.mrf.mxu3  ;;  %v556_v55 = vpop.f32.mrf.mxu1 }
  0xda   : > { %v593_v54 = vadd.f32 %v592_v51, %v573_v49  ;;  %v557_v58 = vadd.f32 %v556_v55, %v537_v52 }
  0xdc   : > { %v636_v56 = vadd.f32 %v632_v50, %v593_v54  ;;  %v637_v0 = vadd.f32 %v631_v48, %v557_v58 }
  0xde   : > { %v643_v57 = vpack.c.bf16 %v636_v56, %v635_v53 }
  0xe0   : > { %647 = vst [vmem:[%s1492_s20] sm:$0xff] %v643_v57  ;;  %v575_v59 = vpop.f32.mrf.mxu2  ;;  %v540_v62 = vpop.f32.mrf.mxu0 }
  0xe1   : > { %v594_v60 = vpop.f32.mrf.mxu3  ;;  %v559_v63 = vpop.f32.mrf.mxu1 }
  0xe2   : > { %v595_v61 = vadd.f32 %v594_v60, %v575_v59  ;;  %v560_v3 = vadd.f32 %v559_v63, %v540_v62 }
  0xe4   : > { %v638_v1 = vadd.f32 %v632_v50, %v595_v61  ;;  %v639_v6 = vadd.f32 %v631_v48, %v560_v3 }
  0xe6   : > { %v644_v2 = vpack.c.bf16 %v638_v1, %v637_v0 }
  0xe8   : > { %648 = vst [vmem:[%s1492_s20 + $0x8] sm:$0xff] %v644_v2  ;;  %v578_v4 = vpop.f32.mrf.mxu2  ;;  %v542_v9 = vpop.f32.mrf.mxu0 }
  0xe9   : > { %v597_v5 = vpop.f32.mrf.mxu3  ;;  %v561_v10 = vpop.f32.mrf.mxu1 }
  0xea   : > { %v598_v7 = vadd.f32 %v597_v5, %v578_v4  ;;  %v562_v12 = vadd.f32 %v561_v10, %v542_v9 }
  0xec   : > { %v640_v8 = vadd.f32 %v632_v50, %v598_v7  ;;  %v641_v16 = vadd.f32 %v631_v48, %v562_v12 }
  0xee   : > { %v645_v11 = vpack.c.bf16 %v640_v8, %v639_v6 }
  0xf0   : > { %649 = vst [vmem:[%s1492_s20 + $0x10] sm:$0xff] %v645_v11  ;;  %v580_v13 = vpop.f32.mrf.mxu2 }
  0xf1   : > { %v599_v14 = vpop.f32.mrf.mxu3 }
  0xf2   : > { %v600_v15 = vadd.f32 %v599_v14, %v580_v13 }
  0xf4   : > { %v642_v17 = vadd.f32 %v632_v50, %v600_v15 }
  0xf6   : > { %v646_v18 = vpack.c.bf16 %v642_v17, %v641_v16 }
  0xf8   : > { %650 = vst [vmem:[%s1492_s20 + $0x18] sm:$0xff] %v646_v18 }
  0xf9   : > { %1200 = shalt.err (!%p1197_p11)
}
  0xfa   : > { %s1265_s9 = smov 128   ;;  %s1266_s6 = smov 384  }
  0xfb   : > { %s1267_s7 = smov 8  }
  0xfc   : > { %1007 = dma.vmem_to_hbm [thread:$0]  (%p1377_p13), %s668_s4, 512, %s670_s5, %s652_s15, %s1265_s9, %s1266_s6, %s1267_s7  }
  0xfd PF: > { %p1027_p12 = scmp.ge.s32.totalorder %s1259_s17, 2  ;;  %s684_s10 = sand.u32 1, %s1239_s12  }
  0xfe   : > { %s685_s11 = scalar_lea.sflag [#allocation5], %s684_s10 }
  0xff   : > { %p1021_p2 = pnand %p1027_p12, %p1381_p0 }
 0x101   : > { %p1022_p3 = pneg %p1021_p2 }
 0x103   : > { %1234 = dma.done.wait (%p1022_p3), %s685_s11, 512  }
 0x104   : > { %1236 = vsyncadd (%p1022_p3), %s685_s11, 4294966784  ;;  %s20_s17 = sadd.s32 1, %s1259_s17   ;;  %s1554_s12 = smov %s1243_s13 }
 0x105   : > { %p17_p1 = scmp.ge.s32.totalorder %s20_s17, 5   ;;  %s1555_s13 = smov %s1247_s14 }
 0x106   : > { %s1556_s14 = smov %s1338_s24  ;;  %s1557_s15 = smov %s1255_s16 }
 0x107   : > { %s1558_s16 = smov %s1560_s18  ;;  %19 = sbr.rel (!%p17_p1) target bundleno = 10 (0xa), region = 102 }
 0x10c   :  { %691 = vsyncpa [#allocation4], 1 }
 0x10d   :  { %693 = vsyncpa [#allocation4 + $0x1], 1 }
 0x10e   :  { %694 = vsyncpa [#allocation7], 1 }
 0x10f   :  { %696 = vsyncpa [#allocation7 + $0x1], 1 }
 0x110   :  { %697 = vsyncpa [#allocation5], 1 }
 0x111   :  { %699 = vsyncpa [#allocation5 + $0x1], 1 }

</bundles_post_ra>
